<compile_context>
chip_gen: v6e
topology: v6e:2x2x1
jax: 0.10.0
libtpu: 0.0.40
codegen_flags: <defaults>
</compile_context>

<pallas_src>
import jax
import jax.numpy as jnp
from jax.experimental import pallas as pl
from jax.experimental.pallas import tpu as pltpu

C = 26                 # number of emotion classes (hard-coded in the PyTorch module)
GROUP = 64             # 64 * 26 = 1664 = 13 * 128 -> lane-dense
LANES = GROUP * C      # 1664
NSPLIT = 2             # leading 'parallel' grid axis (2 TensorCores on v7x)
TR_MAX = 256           # max rows per tile of the (rows, 1664) slab (~1.7 MiB / input / block)


def _cdiv(a, b):
    return -(-a // b)


def _round_up(a, b):
    return _cdiv(a, b) * b


def _fold_to_8_rows(x):
    """(TR, L) -> (8, L) by summing row-groups of 8 (TR is a multiple of 8).

    Pairwise (log-depth) tree of sublane-aligned slices + VPU adds; no cross-lane
    (XLU) work and a short dependency chain so the adds hide under the HBM DMA.
    """
    rows = x.shape[0]
    parts = [x[k * 8:(k + 1) * 8, :] for k in range(rows // 8)]
    while len(parts) > 1:
        nxt = []
        for i in range(0, len(parts) - 1, 2):
            nxt.append(parts[i] + parts[i + 1])
        if len(parts) % 2:
            nxt.append(parts[-1])
        parts = nxt
    return parts[0]


def _combined_loss_kernel(f_ref, cf_ref, t_ref, stats_ref, sse_ref, kl_ref):
    # grid = (split 'parallel', tile 'arbitrary'); outputs are resident across tiles.
    @pl.when(pl.program_id(1) == 0)
    def _init():
        stats_ref[...] = jnp.zeros_like(stats_ref)
        sse_ref[...] = jnp.zeros_like(sse_ref)
        kl_ref[...] = jnp.zeros_like(kl_ref)

    f = f_ref[...].astype(jnp.float32)
    cf = cf_ref[...].astype(jnp.float32)
    t = t_ref[...].astype(jnp.float32)

    df = f - t
    dcf = cf - t
    # Fused: both discrete losses share the same per-class weight, applied in finalize.
    sse = df * df + dcf * dcf
    # F.kl_div(log(cf), f): pointwise f*(log f - log cf), zeroed where f == 0
    # (matches PyTorch xlogy semantics; also makes zero-padded rows contribute exactly 0).
    kl = jnp.where(f > 0.0, f * (jnp.log(f) - jnp.log(cf)), 0.0)

    stats_ref[...] += _fold_to_8_rows(t)
    sse_ref[...] += _fold_to_8_rows(sse)
    kl_ref[...] += _fold_to_8_rows(kl)


def _combined_loss_jnp(factual, counterfactual, labels):
    """Pure-JAX reference / small-batch path (XLA fuses this; no custom-call overhead)."""
    f = factual.astype(jnp.float32)
    cf = counterfactual.astype(jnp.float32)
    t = labels.astype(jnp.float32)
    stats = jnp.sum(t, axis=0, keepdims=True)
    w = jnp.where(stats != 0.0, 1.0 / jnp.log(stats + 1.2), jnp.float32(1e-4))
    disc = jnp.sum((f - t) ** 2 * w) + jnp.sum((cf - t) ** 2 * w)
    kl = jnp.sum(jnp.where(f > 0.0, f * (jnp.log(f) - jnp.log(cf)), 0.0))
    return disc + kl / jnp.float32(f.shape[0])


def _pad_and_reshape(x, b_pad):
    b = x.shape[0]
    if b_pad > b:
        x = jnp.pad(x, ((0, b_pad - b), (0, 0)))
    # Row-major contiguous reshape: pure metadata change, no data movement.
    return x.reshape(b_pad // GROUP, LANES)


def combined_loss_multilabel(factual_fused, counterfactual_fused, predictions, labels,
                             *, min_batch_for_kernel=4096, force_kernel=False):
    # `predictions` intentionally unused (mirrors the PyTorch forward).
    del predictions
    b, c = factual_fused.shape
    assert c == C, f"expected {C} classes, got {c}"

    # For tiny batches the custom-call / DMA overhead dominates: use the fused jnp path.
    if not force_kernel and b < min_batch_for_kernel:
        return _combined_loss_jnp(factual_fused, counterfactual_fused, labels)

    # ---- static tiling math (shapes are Python ints) ----
    rows = _cdiv(b, GROUP)                       # rows of the (rows, 1664) slab
    rows_per_split = _cdiv(rows, NSPLIT)
    tiles_per_split = _cdiv(rows_per_split, TR_MAX)
    tr = _round_up(_cdiv(rows_per_split, tiles_per_split), 8)   # 8 <= tr <= TR_MAX
    rows_pad = NSPLIT * tiles_per_split * tr
    b_pad = rows_pad * GROUP

    # Zero padding contributes 0 to every partial sum (labels=0, f=0, cf=0).
    f2 = _pad_and_reshape(factual_fused, b_pad)
    cf2 = _pad_and_reshape(counterfactual_fused, b_pad)
    t2 = _pad_and_reshape(labels, b_pad)

    in_spec = pl.BlockSpec((tr, LANES), lambda s, i: (s * tiles_per_split + i, 0))
    out_spec = pl.BlockSpec((None, 8, LANES), lambda s, i: (s, 0, 0))
    out_sds = jax.ShapeDtypeStruct((NSPLIT, 8, LANES), jnp.float32)

    n_elems = b_pad * C
    cost = pl.CostEstimate(
        flops=12 * n_elems,
        transcendentals=2 * n_elems,
        bytes_accessed=3 * n_elems * 4 + 3 * NSPLIT * 8 * LANES * 4,
    )

    stats_p, sse_p, kl_p = pl.pallas_call(
        _combined_loss_kernel,
        grid=(NSPLIT, tiles_per_split),
        in_specs=[in_spec, in_spec, in_spec],
        out_specs=[out_spec, out_spec, out_spec],
        out_shape=[out_sds, out_sds, out_sds],
        compiler_params=pltpu.CompilerParams(
            dimension_semantics=("parallel", "arbitrary"),
            vmem_limit_bytes=32 * 1024 * 1024),
        cost_estimate=cost,
    )(f2, cf2, t2)

    # ---- finalize (tiny, pure JAX): fold lanes back to the 26 classes ----
    # lane index = sample_in_group * 26 + class  ->  reshape (GROUP, C) and sum groups.
    stats_c = stats_p.sum(axis=(0, 1)).reshape(GROUP, C).sum(axis=0)    # (26,)
    sse_c = sse_p.sum(axis=(0, 1)).reshape(GROUP, C).sum(axis=0)        # (26,)
    kl_sum = kl_p.sum()

    weights = jnp.where(stats_c != 0.0, 1.0 / jnp.log(stats_c + 1.2), jnp.float32(1e-4))
    disc = jnp.sum(sse_c * weights)               # = fact_loss + cfact_loss
    bias = kl_sum / jnp.float32(b)                # batchmean over the TRUE batch size
    return disc + bias


if __name__ == "__main__":
    key = jax.random.PRNGKey(0)
    k1, k2, k3, k4 = jax.random.split(key, 4)

    # Small, deliberately non-aligned batch to exercise the padding / tiling path.
    B = 200
    factual = jax.nn.softmax(jax.random.normal(k1, (B, C), jnp.float32), axis=-1)
    counterfactual = jax.nn.softmax(jax.random.normal(k2, (B, C), jnp.float32), axis=-1)
    predictions = jax.nn.softmax(jax.random.normal(k3, (B, C), jnp.float32), axis=-1)  # unused
    labels = jax.random.bernoulli(k4, 0.3, (B, C)).astype(jnp.float32)

    # Pallas kernel path.
    total = combined_loss_multilabel(factual, counterfactual, predictions, labels,
                                     force_kernel=True)
    total = jax.block_until_ready(total)
    ref = _combined_loss_jnp(factual, counterfactual, labels)
    assert jnp.allclose(total, ref, rtol=1e-4, atol=1e-4), (total, ref)

    # Small-batch dispatch path (pure jnp, below threshold).
    total_small = combined_loss_multilabel(factual[:8], counterfactual[:8],
                                           predictions[:8], labels[:8])
    total_small = jax.block_until_ready(total_small)
    ref_small = _combined_loss_jnp(factual[:8], counterfactual[:8], labels[:8])
    assert jnp.allclose(total_small, ref_small, rtol=1e-4, atol=1e-4), (total_small, ref_small)

    print("KERNEL_OK")
</pallas_src>

<mosaic_0001>
module attributes {stable_mosaic.version = 11 : i64} {
  func.func @_combined_loss_kernel(%arg0: i32, %arg1: i32, %arg2: memref<8x1664xf32, #tpu.memory_space<vmem>>, %arg3: memref<8x1664xf32, #tpu.memory_space<vmem>>, %arg4: memref<8x1664xf32, #tpu.memory_space<vmem>>, %arg5: memref<1x8x1664xf32, #tpu.memory_space<vmem>>, %arg6: memref<1x8x1664xf32, #tpu.memory_space<vmem>>, %arg7: memref<1x8x1664xf32, #tpu.memory_space<vmem>>) attributes {dimension_semantics = [#tpu.dimension_semantics<parallel>, #tpu.dimension_semantics<arbitrary>], iteration_bounds = array<i64: 2, 1>, scalar_prefetch = 0 : i64, scratch_operands = 0 : i64, tpu.core_type = #tpu.core_type<tc>, window_params = [{transform_indices = @transform_0, window_bounds = array<i64: 8, 1664>}, {transform_indices = @transform_1, window_bounds = array<i64: 8, 1664>}, {transform_indices = @transform_2, window_bounds = array<i64: 8, 1664>}, {transform_indices = @transform_3, window_bounds = array<i64: 1, 8, 1664>}, {transform_indices = @transform_4, window_bounds = array<i64: 1, 8, 1664>}, {transform_indices = @transform_5, window_bounds = array<i64: 1, 8, 1664>}]} {
    %c0_i32 = arith.constant 0 : i32
    %0 = arith.cmpi eq, %arg1, %c0_i32 : i32
    %1 = arith.extui %0 : i1 to i32
    %c0_i32_0 = arith.constant 0 : i32
    %2 = arith.cmpi ne, %1, %c0_i32_0 : i32
    scf.if %2 {
      %cst_25 = arith.constant 0.000000e+00 : f32
      %37 = vector.broadcast %cst_25 : f32 to vector<8x1664xf32>
      %c0_26 = arith.constant 0 : index
      %c0_27 = arith.constant 0 : index
      %c0_28 = arith.constant 0 : index
      %38 = vector.load %arg5[%c0_26, %c0_27, %c0_28] : memref<1x8x1664xf32, #tpu.memory_space<vmem>>, vector<1x8x1664xf32>
      %39 = vector.shape_cast %38 : vector<1x8x1664xf32> to vector<8x1664xf32>
      %40 = vector.shape_cast %37 : vector<8x1664xf32> to vector<1x8x1664xf32>
      tpu.vector_store %arg5[%c0_26, %c0_27, %c0_28], %40 {strides = array<i32>} : memref<1x8x1664xf32, #tpu.memory_space<vmem>>, vector<1x8x1664xf32>,
      %cst_29 = arith.constant 0.000000e+00 : f32
      %41 = vector.broadcast %cst_29 : f32 to vector<8x1664xf32>
      %c0_30 = arith.constant 0 : index
      %c0_31 = arith.constant 0 : index
      %c0_32 = arith.constant 0 : index
      %42 = vector.load %arg6[%c0_30, %c0_31, %c0_32] : memref<1x8x1664xf32, #tpu.memory_space<vmem>>, vector<1x8x1664xf32>
      %43 = vector.shape_cast %42 : vector<1x8x1664xf32> to vector<8x1664xf32>
      %44 = vector.shape_cast %41 : vector<8x1664xf32> to vector<1x8x1664xf32>
      tpu.vector_store %arg6[%c0_30, %c0_31, %c0_32], %44 {strides = array<i32>} : memref<1x8x1664xf32, #tpu.memory_space<vmem>>, vector<1x8x1664xf32>,
      %cst_33 = arith.constant 0.000000e+00 : f32
      %45 = vector.broadcast %cst_33 : f32 to vector<8x1664xf32>
      %c0_34 = arith.constant 0 : index
      %c0_35 = arith.constant 0 : index
      %c0_36 = arith.constant 0 : index
      %46 = vector.load %arg7[%c0_34, %c0_35, %c0_36] : memref<1x8x1664xf32, #tpu.memory_space<vmem>>, vector<1x8x1664xf32>
      %47 = vector.shape_cast %46 : vector<1x8x1664xf32> to vector<8x1664xf32>
      %48 = vector.shape_cast %45 : vector<8x1664xf32> to vector<1x8x1664xf32>
      tpu.vector_store %arg7[%c0_34, %c0_35, %c0_36], %48 {strides = array<i32>} : memref<1x8x1664xf32, #tpu.memory_space<vmem>>, vector<1x8x1664xf32>,
    } else {
    }
    %c0 = arith.constant 0 : index
    %c0_1 = arith.constant 0 : index
    %3 = vector.load %arg2[%c0, %c0_1] : memref<8x1664xf32, #tpu.memory_space<vmem>>, vector<8x1664xf32>
    %c0_2 = arith.constant 0 : index
    %c0_3 = arith.constant 0 : index
    %4 = vector.load %arg3[%c0_2, %c0_3] : memref<8x1664xf32, #tpu.memory_space<vmem>>, vector<8x1664xf32>
    %c0_4 = arith.constant 0 : index
    %c0_5 = arith.constant 0 : index
    %5 = vector.load %arg4[%c0_4, %c0_5] : memref<8x1664xf32, #tpu.memory_space<vmem>>, vector<8x1664xf32>
    %6 = arith.subf %3, %5 : vector<8x1664xf32>
    %7 = arith.subf %4, %5 : vector<8x1664xf32>
    %8 = arith.mulf %6, %6 : vector<8x1664xf32>
    %9 = arith.mulf %7, %7 : vector<8x1664xf32>
    %10 = arith.addf %8, %9 : vector<8x1664xf32>
    %cst = arith.constant 0.000000e+00 : f32
    %11 = vector.broadcast %cst : f32 to vector<8x1664xf32>
    %12 = arith.cmpf ogt, %3, %11 : vector<8x1664xf32>
    %13 = math.log %3 : vector<8x1664xf32>
    %14 = math.log %4 : vector<8x1664xf32>
    %15 = arith.subf %13, %14 : vector<8x1664xf32>
    %16 = arith.mulf %3, %15 : vector<8x1664xf32>
    %cst_6 = arith.constant 0.000000e+00 : f32
    %17 = vector.broadcast %cst_6 : f32 to vector<8x1664xf32>
    %18 = arith.select %12, %16, %17 : vector<8x1664xi1>, vector<8x1664xf32>
    %c0_7 = arith.constant 0 : index
    %c0_8 = arith.constant 0 : index
    %c0_9 = arith.constant 0 : index
    %19 = vector.load %arg5[%c0_7, %c0_8, %c0_9] : memref<1x8x1664xf32, #tpu.memory_space<vmem>>, vector<1x8x1664xf32>
    %20 = vector.shape_cast %19 : vector<1x8x1664xf32> to vector<8x1664xf32>
    %21 = arith.addf %20, %5 : vector<8x1664xf32>
    %c0_10 = arith.constant 0 : index
    %c0_11 = arith.constant 0 : index
    %c0_12 = arith.constant 0 : index
    %22 = vector.load %arg5[%c0_10, %c0_11, %c0_12] : memref<1x8x1664xf32, #tpu.memory_space<vmem>>, vector<1x8x1664xf32>
    %23 = vector.shape_cast %22 : vector<1x8x1664xf32> to vector<8x1664xf32>
    %24 = vector.shape_cast %21 : vector<8x1664xf32> to vector<1x8x1664xf32>
    tpu.vector_store %arg5[%c0_10, %c0_11, %c0_12], %24 {strides = array<i32>} : memref<1x8x1664xf32, #tpu.memory_space<vmem>>, vector<1x8x1664xf32>,
    %c0_13 = arith.constant 0 : index
    %c0_14 = arith.constant 0 : index
    %c0_15 = arith.constant 0 : index
    %25 = vector.load %arg6[%c0_13, %c0_14, %c0_15] : memref<1x8x1664xf32, #tpu.memory_space<vmem>>, vector<1x8x1664xf32>
    %26 = vector.shape_cast %25 : vector<1x8x1664xf32> to vector<8x1664xf32>
    %27 = arith.addf %26, %10 : vector<8x1664xf32>
    %c0_16 = arith.constant 0 : index
    %c0_17 = arith.constant 0 : index
    %c0_18 = arith.constant 0 : index
    %28 = vector.load %arg6[%c0_16, %c0_17, %c0_18] : memref<1x8x1664xf32, #tpu.memory_space<vmem>>, vector<1x8x1664xf32>
    %29 = vector.shape_cast %28 : vector<1x8x1664xf32> to vector<8x1664xf32>
    %30 = vector.shape_cast %27 : vector<8x1664xf32> to vector<1x8x1664xf32>
    tpu.vector_store %arg6[%c0_16, %c0_17, %c0_18], %30 {strides = array<i32>} : memref<1x8x1664xf32, #tpu.memory_space<vmem>>, vector<1x8x1664xf32>,
    %c0_19 = arith.constant 0 : index
    %c0_20 = arith.constant 0 : index
    %c0_21 = arith.constant 0 : index
    %31 = vector.load %arg7[%c0_19, %c0_20, %c0_21] : memref<1x8x1664xf32, #tpu.memory_space<vmem>>, vector<1x8x1664xf32>
    %32 = vector.shape_cast %31 : vector<1x8x1664xf32> to vector<8x1664xf32>
    %33 = arith.addf %32, %18 : vector<8x1664xf32>
    %c0_22 = arith.constant 0 : index
    %c0_23 = arith.constant 0 : index
    %c0_24 = arith.constant 0 : index
    %34 = vector.load %arg7[%c0_22, %c0_23, %c0_24] : memref<1x8x1664xf32, #tpu.memory_space<vmem>>, vector<1x8x1664xf32>
    %35 = vector.shape_cast %34 : vector<1x8x1664xf32> to vector<8x1664xf32>
    %36 = vector.shape_cast %33 : vector<8x1664xf32> to vector<1x8x1664xf32>
    tpu.vector_store %arg7[%c0_22, %c0_23, %c0_24], %36 {strides = array<i32>} : memref<1x8x1664xf32, #tpu.memory_space<vmem>>, vector<1x8x1664xf32>,
    return
  }
  func.func @transform_0(%arg0: i32, %arg1: i32) -> (i32, i32) {
    %c1_i32 = arith.constant 1 : i32
    %0 = arith.muli %arg0, %c1_i32 : i32
    %1 = arith.addi %0, %arg1 : i32
    %c0_i32 = arith.constant 0 : i32
    %c0_i32_0 = arith.constant 0 : i32
    return %1, %c0_i32 : i32, i32
  }
  func.func @transform_1(%arg0: i32, %arg1: i32) -> (i32, i32) {
    %c1_i32 = arith.constant 1 : i32
    %0 = arith.muli %arg0, %c1_i32 : i32
    %1 = arith.addi %0, %arg1 : i32
    %c0_i32 = arith.constant 0 : i32
    %c0_i32_0 = arith.constant 0 : i32
    return %1, %c0_i32 : i32, i32
  }
  func.func @transform_2(%arg0: i32, %arg1: i32) -> (i32, i32) {
    %c1_i32 = arith.constant 1 : i32
    %0 = arith.muli %arg0, %c1_i32 : i32
    %1 = arith.addi %0, %arg1 : i32
    %c0_i32 = arith.constant 0 : i32
    %c0_i32_0 = arith.constant 0 : i32
    return %1, %c0_i32 : i32, i32
  }
  func.func @transform_3(%arg0: i32, %arg1: i32) -> (i32, i32, i32) {
    %c0_i32 = arith.constant 0 : i32
    %c0_i32_0 = arith.constant 0 : i32
    %c0_i32_1 = arith.constant 0 : i32
    return %arg0, %c0_i32, %c0_i32_0 : i32, i32, i32
  }
  func.func @transform_4(%arg0: i32, %arg1: i32) -> (i32, i32, i32) {
    %c0_i32 = arith.constant 0 : i32
    %c0_i32_0 = arith.constant 0 : i32
    %c0_i32_1 = arith.constant 0 : i32
    return %arg0, %c0_i32, %c0_i32_0 : i32, i32, i32
  }
  func.func @transform_5(%arg0: i32, %arg1: i32) -> (i32, i32, i32) {
    %c0_i32 = arith.constant 0 : i32
    %c0_i32_0 = arith.constant 0 : i32
    %c0_i32_1 = arith.constant 0 : i32
    return %arg0, %c0_i32, %c0_i32_0 : i32, i32, i32
  }
}

</mosaic_0001>

<bundles_post_ra>
// kernel: tpu_custom_call.1
= control target key start
LH: loop header
LB: loop body
LE: loop exit
PB: predicated region body
PF: predicated region fallthrough
CT: control target
= control target key end

     0   :  { %s1916_s0 = inlined_call_operand.hbm [shape: f32[16,1664], index: 0, kind: input, shape index: {}]   ;;  %s1917_s1 = inlined_call_operand.hbm [shape: f32[16,1664], index: 1, kind: input, shape index: {}]   ;;  %s1918_s2 = inlined_call_operand.hbm [shape: f32[16,1664], index: 2, kind: input, shape index: {}]   ;;  %s1919_s3 = inlined_call_operand.hbm [shape: f32[2,8,1664], index: 3, kind: output, shape index: {0}]   ;;  %s1920_s4 = inlined_call_operand.hbm [shape: f32[2,8,1664], index: 4, kind: output, shape index: {1}]   ;;  %s1921_s5 = inlined_call_operand.hbm [shape: f32[2,8,1664], index: 5, kind: output, shape index: {2}]  }
   0x1   :  { %1928 = sst [smem:[#allocation20_spill]] %s1917_s1 }
   0x2   :  { %11 = vsyncpa [#allocation3], 0 }
   0x3   :  { %13 = vsyncpa [#allocation3 + $0x1], 0 }
   0x4   :  { %14 = vsyncpa [#allocation6], 0 }
   0x5   :  { %16 = vsyncpa [#allocation6 + $0x1], 0 }
   0x6   :  { %17 = vsyncpa [#allocation4], 0 }
   0x7   :  { %19 = vsyncpa [#allocation4 + $0x1], 0 }
   0x8   :  { %20 = vsyncpa [#allocation10], 0 }
   0x9   :  { %22 = vsyncpa [#allocation10 + $0x1], 0  ;;  %s1382_s18 = smov 0   ;;  %s1384_s19 = smov 0  }
   0xa   :  { %s1386_s20 = smov 0   ;;  %s1388_s21 = smov 0  }
   0xb   :  { %s1390_s22 = smov 0   ;;  %s1392_s23 = smov 0  }
   0xc LB: > { %1929 = sst [smem:[#allocation16_spill]] %s1340_s22  ;;  %s1413_s24 = sadd.s32 4294967295, %s1344_s23   ;;  %s1344_s23 = sphi %s1392_s23, %s28_s23   ;;  %s1340_s22 = sphi %s1390_s22, %s1946_s22   ;;  %s1336_s21 = sphi %s1388_s21, %s1945_s21   ;;  %s1332_s20 = sphi %s1386_s20, %s1949_s20   ;;  %s1328_s19 = sphi %s1384_s19, %s1948_s19   ;;  %s1324_s18 = sphi %s1382_s18, %s1947_s18  }
   0xd   : > { %1930 = sst [smem:[#allocation17_spill]] %s1344_s23  ;;  %s1922_s25 = sadd.s32 4294967294, %s1344_s23  }
   0xe   : > { %s40_s26 = sadd.s32 1, %s1340_s22  ;;  %s49_s27 = sadd.s32 1, %s1332_s20 }
   0xf   : > { %p42_p0 = scmp.ge.s32.totalorder %s40_s26, 2  ;;  %p56_p1 = scmp.ne.s32.totalorder %s1332_s20, %s1328_s19 }
  0x10   : > { %p57_p2 = scmp.eq.s32.totalorder %s1344_s23, 0  ;;  %p62_p3 = scmp.ne.s32.totalorder %s1328_s19, %s1324_s18 }
  0x11   : > { %s1951_s26 = smov (%p42_p0, %s40_s26), 0  ;;  %p63_p5 = scmp.eq.s32.totalorder %s1413_s24, 0 }
  0x12   : > { %1931 = sst [smem:[#allocation18_spill]] %s1951_s26  ;;  %p1425_p4 = por %p57_p2, %p56_p1 }
  0x13   : > { %s46_s29 = ssub.s32 %s1340_s22, %s1951_s26  ;;  %p142_p6 = scmp.eq.s32.totalorder %s1413_s24, 1 }
  0x14   : > { %p47_p7 = scmp.eq.s32.totalorder %s46_s29, 0  ;;  %p1433_p8 = por %p63_p5, %p62_p3 }
  0x15   : > { %p1437_p9 = por %p142_p6, %p56_p1  ;;  %p148_p10 = scmp.eq.s32.totalorder %s1922_s25, 1 }
  0x16   : > { %s1444_s7 = scalar_select %p47_p7, %s1332_s20, %s49_s27  }
  0x17   : > { %p1446_p11 = por %p148_p10, %p62_p3  ;;  %p1017_p13 = scmp.lt.s32.totalorder %s1344_s23, 2 }
  0x18   : > { %1935 = sst [smem:[#allocation19_spill]] %s1444_s7  ;;  %s1923_s9 = sand.u32 1, %s1332_s20  }
  0x19   : > { %s1455_s10 = smul.u32 104, %s1923_s9  ;;  %s240_s11 = sand.u32 1, %s1344_s23  }
  0x1a   : > { %s1459_s12 = smul.u32 1664, %s1340_s22  ;;  %p1463_p0 = pnand %p1017_p13, %p1425_p4 }
  0x1b   : > { %s1938_s1 = sld [smem:[#allocation20_spill]]  ;;  %s244_s17 = scalar_lea.vmem [#allocation5], %s1455_s10 }
  0x1c   : > { %s253_s27 = sshll.u32 %s244_s17, 4  ;;  %p969_p1 = scmp.ge.s32.totalorder %s1344_s23, 1  ;;  %s254_s27 = int_to_ptr.vmem [resolvable:$true] %s253_s27 }
  0x1d   : > { %p278_p2 = scmp.lt.s32.totalorder %s1344_s23, 3  ;;  %s1474_s29 = scalar_lea.sflag [#allocation6], %s240_s11 }
  0x1e   : > { %p1122_p3 = pneg %p1463_p0  ;;  %s1133_s28 = scalar_lea.vmem %s254_s27, 1664 }
  0x1f   : > { %p1134_p4 = scmp.ne.s32.totalorder %s254_s27, %s1133_s28  ;;  %s1346_s25 = smov [#allocation5]  }
  0x20   : > { %s1138_s14 = sshll.u32 %s1346_s25, 4  ;;  %s1139_s14 = int_to_ptr.vmem [resolvable:$false] %s1138_s14 }
  0x21   : > { %s251_s16 = scalar_lea.hbm %s1938_s1, %s1459_s12  ;;  %p1136_p5 = pnand %p1134_p4, %p1122_p3 }
  0x22   : > { %s1140_s15 = scalar_lea.vmem %s1139_s14, 3328  ;;  %p1141_p7 = scmp.lt.s32.totalorder %s254_s27, %s1139_s14 }
  0x23   : > { %p1137_p6 = pneg %p1136_p5  ;;  %p1142_p10 = scmp.lt.s32.totalorder %s1140_s15, %s1133_s28 }
  0x25   : > { %p1143_p13 = por %p1142_p10, %p1141_p7 }
  0x27   : > { %p1144_p12 = pnand %p1143_p13, %p1137_p6 }
  0x29   : > { %1147 = shalt.err (!%p1144_p12)
}
  0x2a   : > { %1003 = dma.hbm_to_vmem [thread:$0]  (!%p1463_p0), %s251_s16, 1664, %s254_s27, %s1474_s29  }
  0x2b   : > { %p1488_p4 = pnand %p969_p1, %p278_p2  ;;  %s231_s28 = scalar_lea.hbm %s1916_s0, %s1459_s12 }
  0x2c   : > { %s224_s14 = scalar_lea.vmem [#allocation2], %s1455_s10  ;;  %s271_s26 = scalar_lea.hbm %s1918_s2, %s1459_s12 }
  0x2d   : > { %s233_s15 = sshll.u32 %s224_s14, 4  ;;  %s1940_s22 = sand.u32 1, %s1332_s20   ;;  %s234_s15 = int_to_ptr.vmem [resolvable:$true] %s233_s15 }
  0x2e   : > { %s221_s7 = scalar_lea.sflag [#allocation3], %s1940_s22  ;;  %s1161_s16 = scalar_lea.vmem %s234_s15, 1664 }
  0x2f   : > { %p1162_p12 = scmp.ne.s32.totalorder %s234_s15, %s1161_s16  ;;  %s1347_s27 = smov [#allocation2]  }
  0x30   : > { %s1166_s23 = sshll.u32 %s1347_s27, 4  ;;  %s1167_s23 = int_to_ptr.vmem [resolvable:$false] %s1166_s23 }
  0x31   : > { %p1164_p1 = pnand %p1162_p12, %p1122_p3  ;;  %s1168_s11 = scalar_lea.vmem %s1167_s23, 3328 }
  0x32   : > { %p1169_p5 = scmp.lt.s32.totalorder %s234_s15, %s1167_s23  ;;  %p1170_p6 = scmp.lt.s32.totalorder %s1168_s11, %s1161_s16 }
  0x33   : > { %p1165_p2 = pneg %p1164_p1 }
  0x34   : > { %p1171_p7 = por %p1170_p6, %p1169_p5 }
  0x36   : > { %p1172_p10 = pnand %p1171_p7, %p1165_p2 }
  0x38   : > { %1175 = shalt.err (!%p1172_p10)
}
  0x39   : > { %1000 = dma.hbm_to_vmem [thread:$0]  (!%p1463_p0), %s231_s28, 1664, %s234_s15, %s221_s7  }
  0x3a   : > { %s264_s1 = scalar_lea.vmem [#allocation7], %s1455_s10  ;;  %s1348_s17 = smov [#allocation7]  }
  0x3b   : > { %s273_s22 = sshll.u32 %s264_s1, 4  ;;  %s1194_s23 = sshll.u32 %s1348_s17, 4  ;;  %s274_s22 = int_to_ptr.vmem [resolvable:$true] %s273_s22  ;;  %s1195_s23 = int_to_ptr.vmem [resolvable:$false] %s1194_s23 }
  0x3c   : > { %s1189_s9 = scalar_lea.vmem %s274_s22, 1664  ;;  %s1196_s14 = scalar_lea.vmem %s1195_s23, 3328 }
  0x3d   : > { %p1190_p13 = scmp.ne.s32.totalorder %s274_s22, %s1189_s9  ;;  %p1197_p2 = scmp.lt.s32.totalorder %s274_s22, %s1195_s23 }
  0x3e   : > { %p1198_p5 = scmp.lt.s32.totalorder %s1196_s14, %s1189_s9 }
  0x3f   : > { %p1192_p12 = pnand %p1190_p13, %p1122_p3 }
  0x40   : > { %p1199_p6 = por %p1198_p5, %p1197_p2 }
  0x41   : > { %p1193_p1 = pneg %p1192_p12 }
  0x43   : > { %p1200_p7 = pnand %p1199_p6, %p1193_p1 }
  0x45   : > { %1203 = shalt.err (!%p1200_p7)
}
  0x46   : > { %1006 = dma.hbm_to_vmem [thread:$0]  (!%p1463_p0), %s271_s26, 1664, %s274_s22, %s1474_s29  }
  0x47   : > { %282 = sbr.rel (%p1488_p4) target bundleno = 183 (0xb7), region = 32  ;;  %s1523_s28 = sand.u32 (!%p1488_p4), 1, %s1328_s19  }
  0x48   : > { %s1526_s15 = smul.u32 (!%p1488_p4), 104, %s1523_s28  ;;  %s285_s13 = scalar_lea.sflag (!%p1488_p4), [#allocation3], %s1523_s28 }
  0x4a   : > { %s1530_s16 = scalar_lea.vmem (!%p1488_p4), [#allocation2], %s1526_s15 }
  0x4c   : > { %1307 = dma.done.wait (%p1433_p8), %s285_s13, 1664  }
  0x4d   : > { %1309 = vsyncadd (%p1433_p8), %s285_s13, 4294965632  ;;  %s293_s26 = sand.u32 1, %s1413_s24   ;;  %s1540_s29 = scalar_lea.vmem [#allocation5], %s1526_s15 }
  0x4e   : > { %s294_s12 = scalar_lea.sflag [#allocation6], %s293_s26 }
  0x4f   : > { %1311 = dma.done.wait (%p1433_p8), %s294_s12, 3328  }
  0x50   : > { %1313 = vsyncadd (%p1433_p8), %s294_s12, 4294963968  ;;  %v1547_v0 = vld [vmem:[%s1530_s16] sm:$0xff]  ;;  %v412_v1 = vld [vmem:[%s1540_s29] sm:$0xff]  ;;  %s1551_s25 = scalar_lea.vmem [#allocation7], %s1526_s15  ;;  %s1578_s30 = scalar_lea.vmem [#allocation8], %s1526_s15 }
  0x51   : > { %v425_v2 = vld [vmem:[%s1551_s25] sm:$0xff]  ;;  %v1556_v5 = vld [vmem:[%s1530_s16 + $0x8] sm:$0xff]  ;;  %v413_v6 = vld [vmem:[%s1540_s29 + $0x8] sm:$0xff]  ;;  %1068 = vlog2.f32 %v412_v1  ;;  %s1609_s27 = scalar_lea.vmem [#allocation9], %s1526_s15  ;;  %s1689_s11 = smul.u32 1664, %s1336_s21 }
  0x52   : > { %v438_v3 = vsub.f32 %v1547_v0, %v425_v2  ;;  %v451_v4 = vsub.f32 %v412_v1, %v425_v2  ;;  %v426_v7 = vld [vmem:[%s1551_s25 + $0x8] sm:$0xff]  ;;  %v1562_v10 = vld [vmem:[%s1530_s16 + $0x10] sm:$0xff]  ;;  %v414_v11 = vld [vmem:[%s1540_s29 + $0x10] sm:$0xff]  ;;  %633 = vst [vmem:[%s1578_s30] sm:$0xff] %v425_v2  ;;  %1070 = vlog2.f32 %v413_v6  ;;  %s749_s1 = sshll.u32 %s1578_s30, 4  ;;  %s763_s22 = sshll.u32 %s1609_s27, 4  ;;  %s1719_s1 = int_to_ptr.vmem [resolvable:$true] %s749_s1  ;;  %s1733_s22 = int_to_ptr.vmem [resolvable:$true] %s763_s22 }
  0x53   : > { %v439_v8 = vsub.f32 %v1556_v5, %v426_v7  ;;  %v452_v9 = vsub.f32 %v413_v6, %v426_v7  ;;  %v1566_v12 = vld [vmem:[%s1551_s25 + $0x10] sm:$0xff]  ;;  %v1572_v17 = vld [vmem:[%s1530_s16 + $0x18] sm:$0xff]  ;;  %v415_v21 = vld [vmem:[%s1540_s29 + $0x18] sm:$0xff]  ;;  %634 = vst [vmem:[%s1578_s30 + $0x8] sm:$0xff] %v426_v7  ;;  %1072 = vlog2.f32 %v414_v11  ;;  %s1717_s17 = scalar_lea.hbm %s1919_s3, %s1689_s11  ;;  %s1731_s7 = scalar_lea.hbm %s1920_s4, %s1689_s11 }
  0x54   : > { %v464_v13 = vmul.f32 %v438_v3, %v438_v3  ;;  %v477_v14 = vmul.f32 %v451_v4, %v451_v4  ;;  %v440_v15 = vsub.f32 %v1562_v10, %v1566_v12  ;;  %v453_v16 = vsub.f32 %v414_v11, %v1566_v12  ;;  %v1575_v18 = vld [vmem:[%s1551_s25 + $0x18] sm:$0xff]  ;;  %v1585_v23 = vld [vmem:[%s1551_s25 + $0x20] sm:$0xff]  ;;  %v1593_v29 = vld [vmem:[%s1551_s25 + $0x28] sm:$0xff]  ;;  %635 = vst [vmem:[%s1578_s30 + $0x10] sm:$0xff] %v1566_v12  ;;  %s725_s10 = scalar_lea.sflag [#allocation4], %s1523_s28  ;;  %s1204_s13 = scalar_lea.vmem %s1719_s1, 1664 }
  0x55   : > { %v465_v19 = vmul.f32 %v439_v8, %v439_v8  ;;  %v478_v20 = vmul.f32 %v452_v9, %v452_v9  ;;  %v441_v22 = vsub.f32 %v1572_v17, %v1575_v18  ;;  %v454_v27 = vsub.f32 %v415_v21, %v1575_v18  ;;  %v1590_v28 = vld [vmem:[%s1530_s16 + $0x20] sm:$0xff]  ;;  %v416_v32 = vld [vmem:[%s1540_s29 + $0x20] sm:$0xff]  ;;  %v1600_v37 = vld [vmem:[%s1530_s16 + $0x28] sm:$0xff]  ;;  %636 = vst [vmem:[%s1578_s30 + $0x18] sm:$0xff] %v1575_v18  ;;  %p1205_p8 = scmp.ne.s32.totalorder %s1719_s1, %s1204_s13 }
  0x56   : > { %v490_v24 = vadd.f32 %v477_v14, %v464_v13  ;;  %v466_v25 = vmul.f32 %v440_v15, %v440_v15  ;;  %v479_v26 = vmul.f32 %v453_v16, %v453_v16  ;;  %v442_v33 = vsub.f32 %v1590_v28, %v1585_v23  ;;  %v1603_v38 = vld [vmem:[%s1551_s25 + $0x30] sm:$0xff]  ;;  %v417_v40 = vld [vmem:[%s1540_s29 + $0x28] sm:$0xff]  ;;  %v418_v46 = vld [vmem:[%s1540_s29 + $0x30] sm:$0xff]  ;;  %637 = vst [vmem:[%s1578_s30 + $0x20] sm:$0xff] %v1585_v23 }
  0x57   : > { %v491_v30 = vadd.f32 %v478_v20, %v465_v19  ;;  %v467_v31 = vmul.f32 %v441_v22, %v441_v22  ;;  %v480_v35 = vmul.f32 %v454_v27, %v454_v27  ;;  %v455_v36 = vsub.f32 %v416_v32, %v1585_v23  ;;  %v1614_v45 = vld [vmem:[%s1530_s16 + $0x30] sm:$0xff]  ;;  %v1618_v47 = vld [vmem:[%s1551_s25 + $0x38] sm:$0xff]  ;;  %v1625_v51 = vld [vmem:[%s1551_s25 + $0x40] sm:$0xff]  ;;  %638 = vst [vmem:[%s1578_s30 + $0x28] sm:$0xff] %v1593_v29  ;;  %p1206_p0 = pnand %p1205_p8, %p1437_p9 }
  0x58   : > { %v492_v34 = vadd.f32 %v479_v26, %v466_v25  ;;  %1074 = vlog2.f32 %v415_v21  ;;  %v468_v39 = vmul.f32 %v442_v33, %v442_v33  ;;  %v443_v41 = vsub.f32 %v1600_v37, %v1593_v29  ;;  %672 = vst [vmem:[%s1609_s27] sm:$0xff] %v490_v24  ;;  %v1629_v54 = vld [vmem:[%s1530_s16 + $0x38] sm:$0xff]  ;;  %v419_v55 = vld [vmem:[%s1540_s29 + $0x38] sm:$0xff]  ;;  %v1636_v60 = vld [vmem:[%s1530_s16 + $0x40] sm:$0xff] }
  0x59   : > { %v493_v42 = vadd.f32 %v480_v35, %v467_v31  ;;  %v481_v43 = vmul.f32 %v455_v36, %v455_v36  ;;  %v456_v44 = vsub.f32 %v417_v40, %v1593_v29  ;;  %673 = vst [vmem:[%s1609_s27 + $0x8] sm:$0xff] %v491_v30  ;;  %1076 = vlog2.f32 %v416_v32  ;;  %v1639_v61 = vld [vmem:[%s1551_s25 + $0x48] sm:$0xff]  ;;  %v420_v63 = vld [vmem:[%s1540_s29 + $0x40] sm:$0xff]  ;;  %v421_v13 = vld [vmem:[%s1540_s29 + $0x48] sm:$0xff]  ;;  %p1207_p3 = pneg %p1206_p0 }
  0x5a   : > { %v469_v48 = vmul.f32 %v443_v41, %v443_v41  ;;  %v444_v49 = vsub.f32 %v1614_v45, %v1603_v38  ;;  %v457_v50 = vsub.f32 %v418_v46, %v1603_v38  ;;  %674 = vst [vmem:[%s1609_s27 + $0x10] sm:$0xff] %v492_v34  ;;  %1078 = vlog2.f32 %v417_v40  ;;  %v1647_v7 = vld [vmem:[%s1530_s16 + $0x48] sm:$0xff]  ;;  %v1650_v8 = vld [vmem:[%s1551_s25 + $0x50] sm:$0xff]  ;;  %v422_v21 = vld [vmem:[%s1540_s29 + $0x50] sm:$0xff] }
  0x5b   : > { %v494_v52 = vadd.f32 %v481_v43, %v468_v39  ;;  %v482_v53 = vmul.f32 %v456_v44, %v456_v44  ;;  %v445_v58 = vsub.f32 %v1629_v54, %v1618_v47  ;;  %v458_v59 = vsub.f32 %v419_v55, %v1618_v47  ;;  %675 = vst [vmem:[%s1609_s27 + $0x18] sm:$0xff] %v493_v42  ;;  %v1660_v20 = vld [vmem:[%s1530_s16 + $0x50] sm:$0xff]  ;;  %v436_v22 = vld [vmem:[%s1551_s25 + $0x58] sm:$0xff]  ;;  %v437_v30 = vld [vmem:[%s1551_s25 + $0x60] sm:$0xff] }
  0x5c   : > { %v470_v56 = vmul.f32 %v444_v49, %v444_v49  ;;  %v483_v57 = vmul.f32 %v457_v50, %v457_v50  ;;  %1080 = vlog2.f32 %v418_v46  ;;  %v446_v1 = vsub.f32 %v1636_v60, %v1625_v51  ;;  %v1673_v33 = vld [vmem:[%s1530_s16 + $0x58] sm:$0xff]  ;;  %v423_v34 = vld [vmem:[%s1540_s29 + $0x58] sm:$0xff]  ;;  %v1680_v42 = vld [vmem:[%s1530_s16 + $0x60] sm:$0xff]  ;;  %639 = vst [vmem:[%s1578_s30 + $0x30] sm:$0xff] %v1603_v38  ;;  %s1349_s16 = smov [#allocation8]  }
  0x5d   : > { %v495_v62 = vadd.f32 %v482_v53, %v469_v48  ;;  %v471_v3 = vmul.f32 %v445_v58, %v445_v58  ;;  %v484_v4 = vmul.f32 %v458_v59, %v458_v59  ;;  %v459_v6 = vsub.f32 %v420_v63, %v1625_v51  ;;  %676 = vst [vmem:[%s1609_s27 + $0x20] sm:$0xff] %v494_v52  ;;  %v424_v44 = vld [vmem:[%s1540_s29 + $0x60] sm:$0xff]  ;;  %s1208_s12 = sshll.u32 %s1349_s16, 4  ;;  %s1209_s12 = int_to_ptr.vmem [resolvable:$false] %s1208_s12 }
  0x5e   : > { %v496_v2 = vadd.f32 %v483_v57, %v470_v56  ;;  %v1652_v9 = vpop.eup %1068  ;;  %1082 = vlog2.f32 %v419_v55  ;;  %v472_v11 = vmul.f32 %v446_v1, %v446_v1  ;;  %v447_v14 = vsub.f32 %v1647_v7, %v1639_v61  ;;  %640 = vst [vmem:[%s1578_s30 + $0x38] sm:$0xff] %v1618_v47  ;;  %641 = vst [vmem:[%s1578_s30 + $0x40] sm:$0xff] %v1625_v51  ;;  %s1210_s29 = scalar_lea.vmem %s1209_s12, 3328  ;;  %p1211_p4 = scmp.lt.s32.totalorder %s1719_s1, %s1209_s12 }
  0x5f   : > { %v497_v15 = vadd.f32 %v484_v4, %v471_v3  ;;  %v485_v16 = vmul.f32 %v459_v6, %v459_v6  ;;  %v460_v19 = vsub.f32 %v421_v13, %v1639_v61  ;;  %v1664_v24 = vpop.eup %1070  ;;  %677 = vst [vmem:[%s1609_s27 + $0x28] sm:$0xff] %v495_v62  ;;  %1084 = vlog2.f32 %v420_v63  ;;  %642 = vst [vmem:[%s1578_s30 + $0x48] sm:$0xff] %v1639_v61  ;;  %p1212_p10 = scmp.lt.s32.totalorder %s1210_s29, %s1204_s13 }
  0x60   : > { %v473_v25 = vmul.f32 %v447_v14, %v447_v14  ;;  %v448_v26 = vsub.f32 %v1660_v20, %v1650_v8  ;;  %v461_v27 = vsub.f32 %v422_v21, %v1650_v8  ;;  %678 = vst [vmem:[%s1609_s27 + $0x30] sm:$0xff] %v496_v2  ;;  %1086 = vlog2.f32 %v421_v13  ;;  %v1676_v35 = vpop.eup %1072  ;;  %643 = vst [vmem:[%s1578_s30 + $0x50] sm:$0xff] %v1650_v8 }
  0x61   : > { %v498_v31 = vadd.f32 %v485_v16, %v472_v11  ;;  %v486_v32 = vmul.f32 %v460_v19, %v460_v19  ;;  %v449_v40 = vsub.f32 %v1673_v33, %v436_v22  ;;  %v462_v41 = vsub.f32 %v423_v34, %v436_v22  ;;  %679 = vst [vmem:[%s1609_s27 + $0x38] sm:$0xff] %v497_v15  ;;  %p1213_p13 = por %p1212_p10, %p1211_p4 }
  0x62   : > { %v474_v36 = vmul.f32 %v448_v26, %v448_v26  ;;  %v487_v39 = vmul.f32 %v461_v27, %v461_v27  ;;  %1088 = vlog2.f32 %v422_v21  ;;  %v450_v46 = vsub.f32 %v1680_v42, %v437_v30  ;;  %644 = vst [vmem:[%s1578_s30 + $0x58] sm:$0xff] %v436_v22  ;;  %645 = vst [vmem:[%s1578_s30 + $0x60] sm:$0xff] %v437_v30 }
  0x63   : > { %v499_v43 = vadd.f32 %v486_v32, %v473_v25  ;;  %v475_v50 = vmul.f32 %v449_v40, %v449_v40  ;;  %v488_v52 = vmul.f32 %v462_v41, %v462_v41  ;;  %v463_v53 = vsub.f32 %v424_v44, %v437_v30  ;;  %680 = vst [vmem:[%s1609_s27 + $0x40] sm:$0xff] %v498_v31  ;;  %p1214_p12 = pnand %p1213_p13, %p1207_p3 }
  0x64   : > { %v500_v49 = vadd.f32 %v487_v39, %v474_v36  ;;  %1090 = vlog2.f32 %v423_v34  ;;  %v476_v55 = vmul.f32 %v450_v46, %v450_v46 }
  0x65   : > { %v1685_v48 = vpop.eup %1074  ;;  %v501_v57 = vadd.f32 %v488_v52, %v475_v50  ;;  %v489_v58 = vmul.f32 %v463_v53, %v463_v53  ;;  %681 = vst [vmem:[%s1609_s27 + $0x48] sm:$0xff] %v499_v43  ;;  %1092 = vlog2.f32 %v424_v44 }
  0x66   : > { %v1691_v56 = vpop.eup %1076  ;;  %682 = vst [vmem:[%s1609_s27 + $0x50] sm:$0xff] %v500_v49  ;;  %1094 = vlog2.f32 %v1547_v0 }
  0x67   : > { %v1694_v59 = vpop.eup %1078  ;;  %v502_v62 = vadd.f32 %v489_v58, %v476_v55  ;;  %683 = vst [vmem:[%s1609_s27 + $0x58] sm:$0xff] %v501_v57  ;;  %1096 = vlog2.f32 %v1556_v5 }
  0x68   : > { %1098 = vlog2.f32 %v1562_v10 }
  0x69   : > { %v1703_v63 = vpop.eup %1080  ;;  %684 = vst [vmem:[%s1609_s27 + $0x60] sm:$0xff] %v502_v62 }
  0x6b   : > { %v1735_v12 = vpop.eup %1082 }
  0x6c   : > { %1217 = shalt.err (!%p1214_p12)
}
  0x6d   : > { %s1218_s25 = scalar_lea.hbm %s1717_s17, 1664  ;;  %s1222_s27 = scalar_lea.hbm %s1919_s3, 3328 }
  0x6e   : > { %p1219_p1 = scmp.ne.s32.totalorder %s1717_s17, %s1218_s25  ;;  %p1223_p6 = scmp.lt.s32.totalorder %s1717_s17, %s1919_s3 }
  0x6f   : > { %p1224_p7 = scmp.lt.s32.totalorder %s1222_s27, %s1218_s25 }
  0x70   : > { %p1220_p2 = pnand %p1219_p1, %p1437_p9 }
  0x71   : > { %p1225_p8 = por %p1224_p7, %p1223_p6 }
  0x72   : > { %p1221_p5 = pneg %p1220_p2 }
  0x74   : > { %p1226_p0 = pnand %p1225_p8, %p1221_p5 }
  0x76   : > { %1229 = shalt.err (!%p1226_p0)
}
  0x77   : > { %991 = dma.vmem_to_hbm [thread:$0]  (%p1437_p9), %s1719_s1, 1664, %s1717_s17, %s725_s10   ;;  %v1085_v18 = vpop.eup %1084  ;;  %1100 = vlog2.f32 %v1572_v17 }
  0x78   : > { %s1768_s23 = scalar_lea.sflag [#allocation10], %s293_s26  ;;  %s1230_s14 = scalar_lea.vmem %s1733_s22, 1664 }
  0x79   : > { %p1231_p3 = scmp.ne.s32.totalorder %s1733_s22, %s1230_s14  ;;  %s1350_s13 = smov [#allocation9]  }
  0x7a   : > { %s1234_s16 = sshll.u32 %s1350_s13, 4  ;;  %s1235_s16 = int_to_ptr.vmem [resolvable:$false] %s1234_s16 }
  0x7b   : > { %p1232_p4 = pnand %p1231_p3, %p1437_p9  ;;  %s1236_s12 = scalar_lea.vmem %s1235_s16, 3328 }
  0x7c   : > { %p1237_p13 = scmp.lt.s32.totalorder %s1733_s22, %s1235_s16  ;;  %p1238_p12 = scmp.lt.s32.totalorder %s1236_s12, %s1230_s14 }
  0x7d   : > { %p1233_p10 = pneg %p1232_p4 }
  0x7e   : > { %p1239_p1 = por %p1238_p12, %p1237_p13 }
  0x80   : > { %p1240_p2 = pnand %p1239_p1, %p1233_p10 }
  0x82   : > { %1243 = shalt.err (!%p1240_p2)
}
  0x83   : > { %s1244_s24 = scalar_lea.hbm %s1731_s7, 1664  ;;  %s1248_s17 = scalar_lea.hbm %s1920_s4, 3328 }
  0x84   : > { %p1245_p5 = scmp.ne.s32.totalorder %s1731_s7, %s1244_s24  ;;  %p1249_p8 = scmp.lt.s32.totalorder %s1731_s7, %s1920_s4 }
  0x85   : > { %p1250_p0 = scmp.lt.s32.totalorder %s1248_s17, %s1244_s24 }
  0x86   : > { %p1246_p6 = pnand %p1245_p5, %p1437_p9 }
  0x87   : > { %p1251_p3 = por %p1250_p0, %p1249_p8 }
  0x88   : > { %p1247_p7 = pneg %p1246_p6 }
  0x8a   : > { %p1252_p4 = pnand %p1251_p3, %p1247_p7 }
  0x8c   : > { %1255 = shalt.err (!%p1252_p4)
}
  0x8d   : > { %992 = dma.vmem_to_hbm [thread:$0]  (%p1437_p9), %s1733_s22, 1664, %s1731_s7, %s1768_s23   ;;  %v1087_v23 = vpop.eup %1086  ;;  %1102 = vlog2.f32 %v1590_v28  ;;  %vm503_vm0 = vcmp.gt.f32.partialorder %v1547_v0, 0.0  ;;  %v543_v47 = vmul.f32 0.6931472, %v1652_v9  ;;  %vm504_vm1 = vcmp.gt.f32.partialorder %v1556_v5, 0.0 }
  0x8e   : > { %1104 = vlog2.f32 %v1600_v37  ;;  %v1089_v29 = vpop.eup %1088  ;;  %v545_v61 = vmul.f32 0.6931472, %v1664_v24  ;;  %vm505_vm2 = vcmp.gt.f32.partialorder %v1562_v10, 0.0  ;;  %v547_v2 = vmul.f32 0.6931472, %v1676_v35  ;;  %s1832_s22 = scalar_lea.vmem [#allocation11], %s1526_s15  ;;  %s775_s28 = scalar_lea.hbm %s1921_s5, %s1689_s11 }
  0x8f   : > { %1106 = vlog2.f32 %v1614_v45  ;;  %v1091_v38 = vpop.eup %1090  ;;  %vm506_vm3 = vcmp.gt.f32.partialorder %v1572_v17, 0.0  ;;  %v549_v3 = vmul.f32 0.6931472, %v1685_v48  ;;  %vm507_vm4 = vcmp.gt.f32.partialorder %v1590_v28, 0.0  ;;  %s777_s15 = sshll.u32 %s1832_s22, 4  ;;  %s1351_s27 = smov [#allocation11]   ;;  %s778_s15 = int_to_ptr.vmem [resolvable:$true] %s777_s15 }
  0x90   : > { %1108 = vlog2.f32 %v1629_v54  ;;  %v1093_v51 = vpop.eup %1092  ;;  %v551_v8 = vmul.f32 0.6931472, %v1691_v56  ;;  %v553_v9 = vmul.f32 0.6931472, %v1694_v59  ;;  %vm508_vm5 = vcmp.gt.f32.partialorder %v1600_v37, 0.0  ;;  %s1256_s30 = scalar_lea.vmem %s778_s15, 1664 }
  0x91   : > { %1110 = vlog2.f32 %v1636_v60  ;;  %v1095_v1 = vpop.eup %1094  ;;  %vm509_vm6 = vcmp.gt.f32.partialorder %v1614_v45, 0.0  ;;  %v555_v14 = vmul.f32 0.6931472, %v1703_v63  ;;  %v557_v21 = vmul.f32 0.6931472, %v1735_v12  ;;  %p1257_p10 = scmp.ne.s32.totalorder %s778_s15, %s1256_s30  ;;  %s1260_s21 = sshll.u32 %s1351_s27, 4  ;;  %s1261_s21 = int_to_ptr.vmem [resolvable:$false] %s1260_s21 }
  0x92   : > { %1112 = vlog2.f32 %v1647_v7  ;;  %v1097_v4 = vpop.eup %1096  ;;  %v517_v6 = vmul.f32 0.6931472, %v1095_v1  ;;  %v559_v22 = vmul.f32 0.6931472, %v1085_v18  ;;  %v561_v27 = vmul.f32 0.6931472, %v1087_v23  ;;  %p1263_p1 = scmp.lt.s32.totalorder %s778_s15, %s1261_s21 }
  0x93   : > { %1114 = vlog2.f32 %v1660_v20  ;;  %v1099_v11 = vpop.eup %1098  ;;  %v519_v13 = vmul.f32 0.6931472, %v1097_v4  ;;  %v1815_v30 = vmul.f32 0.6931472, %v1089_v29  ;;  %vm510_vm7 = vcmp.gt.f32.partialorder %v1629_v54, 0.0  ;;  %p1258_p13 = pnand %p1257_p10, %p1437_p9  ;;  %s1262_s9 = scalar_lea.vmem %s1261_s21, 3328 }
  0x94   : > { %1116 = vlog2.f32 %v1673_v33  ;;  %v1101_v15 = vpop.eup %1100  ;;  %v568_v16 = vsub.f32 %v517_v6, %v543_v47  ;;  %v521_v19 = vmul.f32 0.6931472, %v1099_v11  ;;  %v565_v36 = vmul.f32 0.6931472, %v1091_v38  ;;  %p1264_p2 = scmp.lt.s32.totalorder %s1262_s9, %s1256_s30 }
  0x95   : > { %1118 = vlog2.f32 %v1680_v42  ;;  %v569_v25 = vsub.f32 %v519_v13, %v545_v61  ;;  %v523_v26 = vmul.f32 0.6931472, %v1101_v15  ;;  %vm511_vm8 = vcmp.gt.f32.partialorder %v1636_v60, 0.0  ;;  %p1259_p12 = pneg %p1258_p13 }
  0x96   : > { %v581_v32 = vmul.f32 %v568_v16, %v1547_v0  ;;  %v570_v34 = vsub.f32 %v521_v19, %v547_v2  ;;  %v567_v44 = vmul.f32 0.6931472, %v1093_v51  ;;  %vm512_vm9 = vcmp.gt.f32.partialorder %v1647_v7, 0.0  ;;  %p1265_p5 = por %p1264_p2, %p1263_p1 }
  0x97   : > { %v582_v40 = vmul.f32 %v569_v25, %v1556_v5  ;;  %v571_v41 = vsub.f32 %v523_v26, %v549_v3  ;;  %vm513_vm10 = vcmp.gt.f32.partialorder %v1660_v20, 0.0  ;;  %vm514_vm11 = vcmp.gt.f32.partialorder %v1673_v33, 0.0 }
  0x98   : > { %v594_v48 = vsel %vm503_vm0, %v581_v32, 0.0  ;;  %v583_v49 = vmul.f32 %v570_v34, %v1562_v10  ;;  %vm515_vm12 = vcmp.gt.f32.partialorder %v1680_v42, 0.0  ;;  %p1266_p6 = pnand %p1265_p5, %p1259_p12 }
  0x99   : > { %v595_v55 = vsel %vm504_vm1, %v582_v40, 0.0  ;;  %v584_v56 = vmul.f32 %v571_v41, %v1572_v17  ;;  %711 = vst [vmem:[%s1832_s22] sm:$0xff] %v594_v48 }
  0x9a   : > { %v1103_v24 = vpop.eup %1102  ;;  %v596_v59 = vsel %vm505_vm2, %v583_v49, 0.0  ;;  %712 = vst [vmem:[%s1832_s22 + $0x8] sm:$0xff] %v595_v55 }
  0x9b   : > { %v1105_v31 = vpop.eup %1104  ;;  %v525_v35 = vmul.f32 0.6931472, %v1103_v24  ;;  %v597_v5 = vsel %vm506_vm3, %v584_v56, 0.0  ;;  %713 = vst [vmem:[%s1832_s22 + $0x10] sm:$0xff] %v596_v59 }
  0x9c   : > { %v1107_v39 = vpop.eup %1106  ;;  %v527_v43 = vmul.f32 0.6931472, %v1105_v31  ;;  %714 = vst [vmem:[%s1832_s22 + $0x18] sm:$0xff] %v597_v5 }
  0x9d   : > { %v1109_v46 = vpop.eup %1108  ;;  %v572_v50 = vsub.f32 %v525_v35, %v551_v8  ;;  %v529_v52 = vmul.f32 0.6931472, %v1107_v39 }
  0x9e   : > { %v1111_v53 = vpop.eup %1110  ;;  %v573_v57 = vsub.f32 %v527_v43, %v553_v9  ;;  %v531_v18 = vmul.f32 0.6931472, %v1109_v46 }
  0x9f   : > { %v1113_v58 = vpop.eup %1112  ;;  %v585_v0 = vmul.f32 %v572_v50, %v1590_v28  ;;  %v574_v62 = vsub.f32 %v529_v52, %v555_v14  ;;  %v533_v38 = vmul.f32 0.6931472, %v1111_v53 }
  0xa0   : > { %v1115_v63 = vpop.eup %1114  ;;  %v586_v12 = vmul.f32 %v573_v57, %v1600_v37  ;;  %v575_v17 = vsub.f32 %v531_v18, %v557_v21  ;;  %v535_v61 = vmul.f32 0.6931472, %v1113_v58 }
  0xa1   : > { %v1117_v10 = vpop.eup %1116  ;;  %v598_v23 = vsel %vm507_vm4, %v585_v0, 0.0  ;;  %v587_v29 = vmul.f32 %v574_v62, %v1614_v45  ;;  %v576_v2 = vsub.f32 %v533_v38, %v559_v22  ;;  %v537_v3 = vmul.f32 0.6931472, %v1115_v63 }
  0xa2   : > { %v1119_v47 = vpop.eup %1118  ;;  %v599_v51 = vsel %vm508_vm5, %v586_v12, 0.0  ;;  %715 = vst [vmem:[%s1832_s22 + $0x20] sm:$0xff] %v598_v23  ;;  %v588_v28 = vmul.f32 %v575_v17, %v1629_v54  ;;  %v577_v4 = vsub.f32 %v535_v61, %v561_v27  ;;  %v539_v6 = vmul.f32 0.6931472, %v1117_v10 }
  0xa3   : > { %v600_v1 = vsel %vm509_vm6, %v587_v29, 0.0  ;;  %716 = vst [vmem:[%s1832_s22 + $0x28] sm:$0xff] %v599_v51  ;;  %v589_v8 = vmul.f32 %v576_v2, %v1636_v60  ;;  %v578_v37 = vsub.f32 %v537_v3, %v1815_v30  ;;  %v541_v9 = vmul.f32 0.6931472, %v1119_v47 }
  0xa4   : > { %717 = vst [vmem:[%s1832_s22 + $0x30] sm:$0xff] %v600_v1  ;;  %v601_v45 = vsel %vm510_vm7, %v588_v28, 0.0  ;;  %v590_v11 = vmul.f32 %v577_v4, %v1647_v7  ;;  %v579_v13 = vsub.f32 %v539_v6, %v565_v36 }
  0xa5   : > { %v602_v14 = vsel %vm511_vm8, %v589_v8, 0.0  ;;  %v591_v15 = vmul.f32 %v578_v37, %v1660_v20  ;;  %v580_v16 = vsub.f32 %v541_v9, %v567_v44  ;;  %718 = vst [vmem:[%s1832_s22 + $0x38] sm:$0xff] %v601_v45 }
  0xa6   : > { %v603_v54 = vsel %vm512_vm9, %v590_v11, 0.0  ;;  %v592_v19 = vmul.f32 %v579_v13, %v1673_v33  ;;  %719 = vst [vmem:[%s1832_s22 + $0x40] sm:$0xff] %v602_v14 }
  0xa7   : > { %v604_v21 = vsel %vm513_vm10, %v591_v15, 0.0  ;;  %v593_v22 = vmul.f32 %v580_v16, %v1680_v42  ;;  %720 = vst [vmem:[%s1832_s22 + $0x48] sm:$0xff] %v603_v54 }
  0xa8   : > { %v605_v60 = vsel %vm514_vm11, %v592_v19, 0.0  ;;  %721 = vst [vmem:[%s1832_s22 + $0x50] sm:$0xff] %v604_v21 }
  0xa9   : > { %v606_v20 = vsel %vm515_vm12, %v593_v22, 0.0  ;;  %722 = vst [vmem:[%s1832_s22 + $0x58] sm:$0xff] %v605_v60 }
  0xaa   : > { %723 = vst [vmem:[%s1832_s22 + $0x60] sm:$0xff] %v606_v20 }
  0xab   : > { %1269 = shalt.err (!%p1266_p6)
}
  0xac   : > { %s1270_s14 = scalar_lea.hbm %s775_s28, 1664  ;;  %s1274_s16 = scalar_lea.hbm %s1921_s5, 3328 }
  0xad   : > { %p1271_p7 = scmp.ne.s32.totalorder %s775_s28, %s1270_s14  ;;  %p1275_p3 = scmp.lt.s32.totalorder %s775_s28, %s1921_s5 }
  0xae   : > { %p1276_p4 = scmp.lt.s32.totalorder %s1274_s16, %s1270_s14 }
  0xaf   : > { %p1272_p8 = pnand %p1271_p7, %p1437_p9 }
  0xb0   : > { %p1277_p10 = por %p1276_p4, %p1275_p3 }
  0xb1   : > { %p1273_p0 = pneg %p1272_p8 }
  0xb3   : > { %p1278_p13 = pnand %p1277_p10, %p1273_p0 }
  0xb5   : > { %1281 = shalt.err (!%p1278_p13)
}
  0xb6   : > { %993 = dma.vmem_to_hbm [thread:$0]  (%p1437_p9), %s778_s15, 1664, %s775_s28, %s1768_s23  }
  0xb7 PF: > { %s1941_s26 = sld [smem:[#allocation17_spill]]  ;;  %s789_s1 = sand.u32 1, %s1324_s18  }
  0xb8   : > { %s790_s17 = scalar_lea.sflag [#allocation4], %s789_s1 }
  0xbd   : > { %p1942_p12 = scmp.ge.s32.totalorder %s1941_s26, 2 }
  0xbf   : > { %p1008_p1 = pnand %p1942_p12, %p1446_p11 }
  0xc1   : > { %p1009_p2 = pneg %p1008_p1 }
  0xc3   : > { %1315 = dma.done.wait (%p1009_p2), %s790_s17, 1664  }
  0xc4   : > { %1317 = vsyncadd (%p1009_p2), %s790_s17, 4294965632  ;;  %s1943_s10 = sadd.s32 4294967294, %s1941_s26  }
  0xc5   : > { %s798_s29 = sand.u32 1, %s1943_s10  }
  0xc6   : > { %s799_s22 = scalar_lea.sflag [#allocation10], %s798_s29 }
  0xc7   : > { %1319 = dma.done.wait (%p1009_p2), %s799_s22, 3328  }
  0xc8   : > { %1321 = vsyncadd (%p1009_p2), %s799_s22, 4294963968  ;;  %s28_s23 = sadd.s32 1, %s1941_s26   ;;  %s1944_s6 = sld [smem:[#allocation19_spill]] }
  0xc9   : > { %p25_p9 = scmp.ge.s32.totalorder %s28_s23, 4   ;;  %s1945_s21 = sld [smem:[#allocation16_spill]] }
  0xca   : > { %s1946_s22 = sld [smem:[#allocation18_spill]]  ;;  %s1947_s18 = smov %s1328_s19 }
  0xcb   : > { %s1948_s19 = smov %s1332_s20  ;;  %27 = sbr.rel (!%p25_p9) target bundleno = 12 (0xc), region = 137 }
  0xce   : > { %s1949_s20 = smov %s1944_s6 }
  0xd0   :  { %813 = vsyncpa [#allocation3], 1 }
  0xd1   :  { %815 = vsyncpa [#allocation3 + $0x1], 1 }
  0xd2   :  { %816 = vsyncpa [#allocation6], 1 }
  0xd3   :  { %818 = vsyncpa [#allocation6 + $0x1], 1 }
  0xd4   :  { %819 = vsyncpa [#allocation4], 1 }
  0xd5   :  { %821 = vsyncpa [#allocation4 + $0x1], 1 }
  0xd6   :  { %822 = vsyncpa [#allocation10], 1 }
  0xd7   :  { %824 = vsyncpa [#allocation10 + $0x1], 1 }

</bundles_post_ra>
